<compile_context>
chip_gen: v7x
topology: tpu7x:2x2x1
jax: 0.10.0
libtpu: 0.0.40
codegen_flags: <defaults>
</compile_context>

<pallas_src>
import functools

import jax
import jax.numpy as jnp
from jax.experimental import pallas as pl
from jax.experimental.pallas import tpu as pltpu

_MET_LANES = 128  # lane-padded width of the 4-wide metrics head


def _round_up(x, m):
    return (x + m - 1) // m * m


def _pad2(x, rows, cols):
    return jnp.pad(x, ((0, rows - x.shape[0]), (0, cols - x.shape[1])))


def _choose_tile(batch):
    b8 = _round_up(batch, 8)
    if b8 <= 8:
        return 8
    # >= 2 batch tiles lets the "parallel" axis shard across v7x's 2 TensorCores
    # (megacore); 256 rows still fills the 256-row MXU while halving tile VMEM.
    return min(256, _round_up((b8 + 1) // 2, 8))


def _resident_spec(shape):
    """BlockSpec for a grid-invariant (VMEM-resident) operand.

    Single-buffered when supported: a constant index_map block is fetched once,
    so it never needs a prefetch buffer (halves resident weight VMEM).
    """
    index_map = lambda i: (0,) * len(shape)
    try:
        return pl.BlockSpec(shape, index_map, pipeline_mode=pl.Buffered(1))
    except Exception:  # older JAX without pipeline_mode / Buffered
        return pl.BlockSpec(shape, index_map)


def _self_reflection_kernel(cur_ref, mem_ref,
                            w1c_ref, w1m_ref, b1_ref,
                            w2_ref, b2_ref,
                            w3_ref, b3_ref,
                            analyzed_ref, msum_ref,
                            *, batch_size, tile_rows):
    # Activations arrive as padded f32; cast to bf16 on the VPU right before the
    # MXU (saves a full XLA cast pass over cur/mem in HBM).
    cur = cur_ref[...].astype(jnp.bfloat16)
    mem = mem_ref[...].astype(jnp.bfloat16)

    # Layer 1: concat([cur, mem], -1) @ W1 + b1 as two MXU matmuls (split-W1).
    h = (jnp.dot(cur, w1c_ref[...], preferred_element_type=jnp.float32)
         + jnp.dot(mem, w1m_ref[...], preferred_element_type=jnp.float32)
         + b1_ref[...])
    h = jnp.maximum(h, 0.0)                                   # ReLU (f32, VPU)

    # Layer 2: h @ W2 + b2 -> analyzed (stored f32, PyTorch semantics)
    analyzed = (jnp.dot(h.astype(jnp.bfloat16), w2_ref[...],
                        preferred_element_type=jnp.float32)
                + b2_ref[...])
    analyzed_ref[...] = analyzed.astype(analyzed_ref.dtype)

    # Metrics head: sigmoid(analyzed @ W3 + b3), lane-padded to 128 wide.
    logits = (jnp.dot(analyzed.astype(jnp.bfloat16), w3_ref[...],
                      preferred_element_type=jnp.float32)
              + b3_ref[...])
    sig = jax.nn.sigmoid(logits)                              # (tile_rows, 128) f32

    # Only the 4 per-column means are consumed downstream: emit masked per-tile
    # column sums instead of the full (Bp, 128) slab (saves the HBM write + the
    # re-read by jnp.mean). Padded batch rows produce sigmoid(b3) != 0 -> mask.
    row = (jax.lax.broadcasted_iota(jnp.int32, sig.shape, 0)
           + pl.program_id(0) * tile_rows)
    sig = jnp.where(row < batch_size, sig, 0.0)
    col_sums = jnp.sum(sig, axis=0, keepdims=True)            # (1, 128)
    msum_ref[...] = jnp.broadcast_to(col_sums, msum_ref.shape).astype(msum_ref.dtype)


def prepare_params(params):
    """One-time weight preprocessing: transpose, zero-pad, bf16 cast.

    Hoisted out of the per-call forward so the steady-state weight HBM traffic
    is just the bf16 reads done by the kernel (biggest win in the bandwidth-
    bound small-batch regime, especially on v5e).
    """
    w1, b1 = params["w1"], params["b1"]
    w2, b2 = params["w2"], params["b2"]
    w3, b3 = params["w3"], params["b3"]
    H = w2.shape[0]
    # Pad hidden dim to 256: fills the 2x256^2 MXU on v6e/v7x (no effect on v5e).
    Hp = _round_up(H, 256)

    w1_t = w1.T                                   # PyTorch Linear is [out, in]
    prepared = {
        "w1c": _pad2(w1_t[:H, :], Hp, Hp).astype(jnp.bfloat16),
        "w1m": _pad2(w1_t[H:, :], Hp, Hp).astype(jnp.bfloat16),
        "b1": _pad2(b1.reshape(1, H), 1, Hp).astype(jnp.float32),
        "w2": _pad2(w2.T, Hp, Hp).astype(jnp.bfloat16),
        "b2": _pad2(b2.reshape(1, H), 1, Hp).astype(jnp.float32),
        "w3": _pad2(w3.T, Hp, _MET_LANES).astype(jnp.bfloat16),
        "b3": _pad2(b3.reshape(1, 4), 1, _MET_LANES).astype(jnp.float32),
    }
    return jax.tree_util.tree_map(jnp.asarray, prepared)


def _forward_impl(current_state, memory_state, prepared):
    B, H = current_state.shape
    Hp = prepared["w2"].shape[0]

    tm = _choose_tile(B)                          # batch tile (sublane-aligned)
    Bp = _round_up(B, tm)
    nb = Bp // tm

    # Pad activations (stay f32; bf16 cast happens inside the kernel).
    cur = _pad2(current_state.astype(jnp.float32), Bp, Hp)
    mem = _pad2(memory_state.astype(jnp.float32), Bp, Hp)

    # --- VMEM budget (ceiling, computed from actual buffers; defaults are only
    #     16 MiB on v5e / 32 MiB on v6e+v7x and too small for large H) ---
    f32b, bf16b = 4, 2
    resident_w = (3 * Hp * Hp + Hp * _MET_LANES) * bf16b + (2 * Hp + _MET_LANES) * f32b
    act_tiles = 2 * 2 * tm * Hp * f32b                        # cur+mem, double-buffered
    out_tiles = 2 * (tm * Hp * f32b + 8 * _MET_LANES * f32b)  # analyzed + metric sums
    scratch = tm * Hp * (f32b + bf16b) * 2 + 2 * tm * _MET_LANES * f32b
    needed = 2 * resident_w + act_tiles + out_tiles + scratch  # 2x: covers fallback
    vmem_limit = int(min(max(int(needed * 1.25) + (4 << 20), 32 << 20), 100 << 20))

    # --- cost hint for XLA scheduling around the call ---
    flops = 2 * Bp * (3 * Hp * Hp + Hp * _MET_LANES)
    bytes_accessed = (2 * Bp * Hp * f32b                      # cur, mem (f32)
                      + 3 * Hp * Hp * bf16b                   # w1c, w1m, w2 (bf16)
                      + Hp * _MET_LANES * bf16b               # w3 (bf16)
                      + (2 * Hp + _MET_LANES) * f32b          # biases (f32)
                      + Bp * Hp * f32b                        # analyzed (f32)
                      + nb * 8 * _MET_LANES * f32b)           # metric partial sums
    cost = pl.CostEstimate(flops=flops,
                           transcendentals=Bp * _MET_LANES,
                           bytes_accessed=bytes_accessed)

    grid_spec = pl.GridSpec(
        grid=(nb,),
        in_specs=[
            pl.BlockSpec((tm, Hp), lambda i: (i, 0)),         # current_state tile
            pl.BlockSpec((tm, Hp), lambda i: (i, 0)),         # memory_state tile
            _resident_spec((Hp, Hp)),                         # w1c (VMEM-resident)
            _resident_spec((Hp, Hp)),                         # w1m (VMEM-resident)
            _resident_spec((1, Hp)),                          # b1
            _resident_spec((Hp, Hp)),                         # w2  (VMEM-resident)
            _resident_spec((1, Hp)),                          # b2
            _resident_spec((Hp, _MET_LANES)),                 # w3  (VMEM-resident)
            _resident_spec((1, _MET_LANES)),                  # b3
        ],
        out_specs=[
            pl.BlockSpec((tm, Hp), lambda i: (i, 0)),             # analyzed tile
            pl.BlockSpec((1, 8, _MET_LANES), lambda i: (i, 0, 0)),  # metric col-sums
        ],
    )

    kernel = functools.partial(_self_reflection_kernel,
                               batch_size=B, tile_rows=tm)

    analyzed_p, msum_p = pl.pallas_call(
        kernel,
        out_shape=(
            jax.ShapeDtypeStruct((Bp, Hp), jnp.float32),
            jax.ShapeDtypeStruct((nb, 8, _MET_LANES), jnp.float32),
        ),
        grid_spec=grid_spec,
        compiler_params=pltpu.CompilerParams(
            dimension_semantics=("parallel",),
            vmem_limit_bytes=vmem_limit),
        cost_estimate=cost,
    )(cur, mem,
      prepared["w1c"], prepared["w1m"], prepared["b1"],
      prepared["w2"], prepared["b2"],
      prepared["w3"], prepared["b3"])

    analyzed = analyzed_p[:B, :H]
    metric_means = jnp.sum(msum_p[:, 0, :4], axis=0) / B      # finish the mean
    return analyzed, metric_means


_forward_jit = jax.jit(_forward_impl)


def self_reflection_forward(current_state, memory_state, prepared):
    """SelfReflectionModule forward. Returns (analyzed [B, H], metrics_dict)."""
    analyzed, metric_means = _forward_jit(current_state, memory_state, prepared)
    means = jax.device_get(metric_means)          # single host sync for all 4 scalars
    metrics_dict = {
        "coherence": float(means[0]),
        "self_awareness": float(means[1]),
        "integration": float(means[2]),
        "adaptability": float(means[3]),
    }
    return analyzed, metrics_dict


def init_params(hidden_size, key):
    """Deterministic synthetic parameters matching nn.Linear shapes."""
    ks = jax.random.split(key, 3)

    def lin(k, out_f, in_f):
        bound = 1.0 / jnp.sqrt(in_f)
        kw, kb = jax.random.split(k)
        w = jax.random.uniform(kw, (out_f, in_f), jnp.float32, -bound, bound)
        b = jax.random.uniform(kb, (out_f,), jnp.float32, -bound, bound)
        return w, b

    w1, b1 = lin(ks[0], hidden_size, hidden_size * 2)   # state_analyzer[0]
    w2, b2 = lin(ks[1], hidden_size, hidden_size)       # state_analyzer[2]
    w3, b3 = lin(ks[2], 4, hidden_size)                 # awareness_metrics[0]
    return {"w1": w1, "b1": b1, "w2": w2, "b2": b2, "w3": w3, "b3": b3}


if __name__ == "__main__":
    B, H = 2, 32
    key = jax.random.PRNGKey(0)
    k_cur, k_mem, k_par = jax.random.split(key, 3)
    current_state = jax.random.normal(k_cur, (B, H), jnp.float32)
    memory_state = jax.random.normal(k_mem, (B, H), jnp.float32)
    params = init_params(H, k_par)

    prepared = prepare_params(params)             # one-time weight preprocessing
    analyzed, metrics_dict = self_reflection_forward(current_state, memory_state, prepared)
    jax.block_until_ready(analyzed)

    # --- reference 1: same bf16-operand / f32-accumulate decomposition (tight) ---
    bf = jnp.bfloat16
    w1_t = params["w1"].T
    h_ref = jnp.maximum(
        jnp.dot(current_state.astype(bf), w1_t[:H, :].astype(bf),
                preferred_element_type=jnp.float32)
        + jnp.dot(memory_state.astype(bf), w1_t[H:, :].astype(bf),
                  preferred_element_type=jnp.float32)
        + params["b1"], 0.0)
    analyzed_ref = (jnp.dot(h_ref.astype(bf), params["w2"].T.astype(bf),
                            preferred_element_type=jnp.float32) + params["b2"])
    metrics_ref = jax.nn.sigmoid(
        jnp.dot(analyzed_ref.astype(bf), params["w3"].T.astype(bf),
                preferred_element_type=jnp.float32) + params["b3"])
    assert jnp.allclose(analyzed, analyzed_ref, atol=1e-4, rtol=1e-4)
    assert abs(metrics_dict["coherence"] - float(jnp.mean(metrics_ref[:, 0]))) < 1e-3
    assert abs(metrics_dict["self_awareness"] - float(jnp.mean(metrics_ref[:, 1]))) < 1e-3
    assert abs(metrics_dict["integration"] - float(jnp.mean(metrics_ref[:, 2]))) < 1e-3
    assert abs(metrics_dict["adaptability"] - float(jnp.mean(metrics_ref[:, 3]))) < 1e-3

    # --- reference 2: full-precision PyTorch-semantics check (loose, bf16 error) ---
    combined = jnp.concatenate([current_state, memory_state], axis=-1)
    h_f32 = jnp.maximum(combined @ params["w1"].T + params["b1"], 0.0)
    analyzed_f32 = h_f32 @ params["w2"].T + params["b2"]
    assert jnp.allclose(analyzed, analyzed_f32, atol=0.1, rtol=0.1)

    print("KERNEL_OK")
</pallas_src>

<mosaic_0001>
module attributes {stable_mosaic.version = 11 : i64} {
  func.func @_self_reflection_kernel(%arg0: i32, %arg1: memref<8x256xf32, #tpu.memory_space<vmem>>, %arg2: memref<8x256xf32, #tpu.memory_space<vmem>>, %arg3: memref<256x256xbf16, #tpu.memory_space<vmem>>, %arg4: memref<256x256xbf16, #tpu.memory_space<vmem>>, %arg5: memref<1x256xf32, #tpu.memory_space<vmem>>, %arg6: memref<256x256xbf16, #tpu.memory_space<vmem>>, %arg7: memref<1x256xf32, #tpu.memory_space<vmem>>, %arg8: memref<256x128xbf16, #tpu.memory_space<vmem>>, %arg9: memref<1x128xf32, #tpu.memory_space<vmem>>, %arg10: memref<8x256xf32, #tpu.memory_space<vmem>>, %arg11: memref<1x8x128xf32, #tpu.memory_space<vmem>>) attributes {dimension_semantics = [#tpu.dimension_semantics<parallel>], iteration_bounds = array<i64: 1>, scalar_prefetch = 0 : i64, scratch_operands = 0 : i64, tpu.core_type = #tpu.core_type<tc>, window_params = [{transform_indices = @transform_0, window_bounds = array<i64: 8, 256>}, {transform_indices = @transform_1, window_bounds = array<i64: 8, 256>}, {pipeline_mode = #tpu.pipeline_mode<synchronous>, transform_indices = @transform_2, window_bounds = array<i64: 256, 256>}, {pipeline_mode = #tpu.pipeline_mode<synchronous>, transform_indices = @transform_3, window_bounds = array<i64: 256, 256>}, {pipeline_mode = #tpu.pipeline_mode<synchronous>, transform_indices = @transform_4, window_bounds = array<i64: 1, 256>}, {pipeline_mode = #tpu.pipeline_mode<synchronous>, transform_indices = @transform_5, window_bounds = array<i64: 256, 256>}, {pipeline_mode = #tpu.pipeline_mode<synchronous>, transform_indices = @transform_6, window_bounds = array<i64: 1, 256>}, {pipeline_mode = #tpu.pipeline_mode<synchronous>, transform_indices = @transform_7, window_bounds = array<i64: 256, 128>}, {pipeline_mode = #tpu.pipeline_mode<synchronous>, transform_indices = @transform_8, window_bounds = array<i64: 1, 128>}, {transform_indices = @transform_9, window_bounds = array<i64: 8, 256>}, {transform_indices = @transform_10, window_bounds = array<i64: 1, 8, 128>}]} {
    %c0 = arith.constant 0 : index
    %c0_0 = arith.constant 0 : index
    %0 = vector.load %arg1[%c0, %c0_0] : memref<8x256xf32, #tpu.memory_space<vmem>>, vector<8x256xf32>
    %1 = arith.truncf %0 : vector<8x256xf32> to vector<8x256xbf16>
    %c0_1 = arith.constant 0 : index
    %c0_2 = arith.constant 0 : index
    %2 = vector.load %arg2[%c0_1, %c0_2] : memref<8x256xf32, #tpu.memory_space<vmem>>, vector<8x256xf32>
    %3 = arith.truncf %2 : vector<8x256xf32> to vector<8x256xbf16>
    %c0_3 = arith.constant 0 : index
    %c0_4 = arith.constant 0 : index
    %4 = vector.load %arg3[%c0_3, %c0_4] : memref<256x256xbf16, #tpu.memory_space<vmem>>, vector<256x256xbf16>
    %cst = arith.constant dense<0.000000e+00> : vector<8x256xf32>
    %5 = tpu.matmul %1, %4, %cst {dimension_numbers = #tpu.dot_dimension_numbers<[1], [0], [0], [1], [0, 0, 1, 1], [], []>} : vector<8x256xbf16>, vector<256x256xbf16>, vector<8x256xf32> -> vector<8x256xf32>
    %c0_5 = arith.constant 0 : index
    %c0_6 = arith.constant 0 : index
    %6 = vector.load %arg4[%c0_5, %c0_6] : memref<256x256xbf16, #tpu.memory_space<vmem>>, vector<256x256xbf16>
    %cst_7 = arith.constant dense<0.000000e+00> : vector<8x256xf32>
    %7 = tpu.matmul %3, %6, %cst_7 {dimension_numbers = #tpu.dot_dimension_numbers<[1], [0], [0], [1], [0, 0, 1, 1], [], []>} : vector<8x256xbf16>, vector<256x256xbf16>, vector<8x256xf32> -> vector<8x256xf32>
    %8 = arith.addf %5, %7 : vector<8x256xf32>
    %c0_8 = arith.constant 0 : index
    %c0_9 = arith.constant 0 : index
    %9 = vector.load %arg5[%c0_8, %c0_9] : memref<1x256xf32, #tpu.memory_space<vmem>>, vector<1x256xf32>
    %10 = vector.broadcast %9 : vector<1x256xf32> to vector<8x256xf32>
    %11 = arith.addf %8, %10 : vector<8x256xf32>
    %cst_10 = arith.constant 0.000000e+00 : f32
    %12 = vector.broadcast %cst_10 : f32 to vector<8x256xf32>
    %13 = arith.maximumf %11, %12 : vector<8x256xf32>
    %14 = arith.truncf %13 : vector<8x256xf32> to vector<8x256xbf16>
    %c0_11 = arith.constant 0 : index
    %c0_12 = arith.constant 0 : index
    %15 = vector.load %arg6[%c0_11, %c0_12] : memref<256x256xbf16, #tpu.memory_space<vmem>>, vector<256x256xbf16>
    %cst_13 = arith.constant dense<0.000000e+00> : vector<8x256xf32>
    %16 = tpu.matmul %14, %15, %cst_13 {dimension_numbers = #tpu.dot_dimension_numbers<[1], [0], [0], [1], [0, 0, 1, 1], [], []>} : vector<8x256xbf16>, vector<256x256xbf16>, vector<8x256xf32> -> vector<8x256xf32>
    %c0_14 = arith.constant 0 : index
    %c0_15 = arith.constant 0 : index
    %17 = vector.load %arg7[%c0_14, %c0_15] : memref<1x256xf32, #tpu.memory_space<vmem>>, vector<1x256xf32>
    %18 = vector.broadcast %17 : vector<1x256xf32> to vector<8x256xf32>
    %19 = arith.addf %16, %18 : vector<8x256xf32>
    %c0_16 = arith.constant 0 : index
    %c0_17 = arith.constant 0 : index
    %20 = vector.load %arg10[%c0_16, %c0_17] : memref<8x256xf32, #tpu.memory_space<vmem>>, vector<8x256xf32>
    tpu.vector_store %arg10[%c0_16, %c0_17], %19 {strides = array<i32>} : memref<8x256xf32, #tpu.memory_space<vmem>>, vector<8x256xf32>,
    %21 = arith.truncf %19 : vector<8x256xf32> to vector<8x256xbf16>
    %c0_18 = arith.constant 0 : index
    %c0_19 = arith.constant 0 : index
    %22 = vector.load %arg8[%c0_18, %c0_19] : memref<256x128xbf16, #tpu.memory_space<vmem>>, vector<256x128xbf16>
    %cst_20 = arith.constant dense<0.000000e+00> : vector<8x128xf32>
    %23 = tpu.matmul %21, %22, %cst_20 {dimension_numbers = #tpu.dot_dimension_numbers<[1], [0], [0], [1], [0, 0, 1, 1], [], []>} : vector<8x256xbf16>, vector<256x128xbf16>, vector<8x128xf32> -> vector<8x128xf32>
    %c0_21 = arith.constant 0 : index
    %c0_22 = arith.constant 0 : index
    %24 = vector.load %arg9[%c0_21, %c0_22] : memref<1x128xf32, #tpu.memory_space<vmem>>, vector<1x128xf32>
    %25 = vector.broadcast %24 : vector<1x128xf32> to vector<8x128xf32>
    %26 = arith.addf %23, %25 : vector<8x128xf32>
    %27 = arith.negf %26 : vector<8x128xf32>
    %28 = math.exp %27 : vector<8x128xf32>
    %cst_23 = arith.constant 1.000000e+00 : f32
    %29 = vector.broadcast %cst_23 : f32 to vector<8x128xf32>
    %30 = arith.addf %29, %28 : vector<8x128xf32>
    %31 = arith.divf %29, %30 : vector<8x128xf32>
    %32 = tpu.iota {dimensions = array<i32: 0>} : vector<8x128xi32>
    %c8_i32 = arith.constant 8 : i32
    %33 = arith.muli %arg0, %c8_i32 : i32
    %34 = vector.broadcast %33 : i32 to vector<8x128xi32>
    %35 = arith.addi %32, %34 : vector<8x128xi32>
    %c2_i32 = arith.constant 2 : i32
    %36 = vector.broadcast %c2_i32 : i32 to vector<8x128xi32>
    %37 = arith.cmpi slt, %35, %36 : vector<8x128xi32>
    %cst_24 = arith.constant 0.000000e+00 : f32
    %38 = vector.broadcast %cst_24 : f32 to vector<8x128xf32>
    %39 = arith.select %37, %31, %38 : vector<8x128xi1>, vector<8x128xf32>
    %cst_25 = arith.constant dense<0.000000e+00> : vector<128xf32>
    %40 = vector.multi_reduction <add>, %39, %cst_25 [0] : vector<8x128xf32> to vector<128xf32>
    %41 = vector.shape_cast %40 : vector<128xf32> to vector<1x128xf32>
    %42 = vector.shape_cast %41 : vector<1x128xf32> to vector<1x1x128xf32>
    %43 = vector.broadcast %42 : vector<1x1x128xf32> to vector<1x8x128xf32>
    %c0_26 = arith.constant 0 : index
    %c0_27 = arith.constant 0 : index
    %c0_28 = arith.constant 0 : index
    %44 = vector.load %arg11[%c0_26, %c0_27, %c0_28] : memref<1x8x128xf32, #tpu.memory_space<vmem>>, vector<1x8x128xf32>
    tpu.vector_store %arg11[%c0_26, %c0_27, %c0_28], %43 {strides = array<i32>} : memref<1x8x128xf32, #tpu.memory_space<vmem>>, vector<1x8x128xf32>,
    return
  }
  func.func @transform_0(%arg0: i32) -> (i32, i32) {
    %c0_i32 = arith.constant 0 : i32
    %c0_i32_0 = arith.constant 0 : i32
    return %arg0, %c0_i32 : i32, i32
  }
  func.func @transform_1(%arg0: i32) -> (i32, i32) {
    %c0_i32 = arith.constant 0 : i32
    %c0_i32_0 = arith.constant 0 : i32
    return %arg0, %c0_i32 : i32, i32
  }
  func.func @transform_2(%arg0: i32) -> (i32, i32) {
    %c0_i32 = arith.constant 0 : i32
    %c0_i32_0 = arith.constant 0 : i32
    %c0_i32_1 = arith.constant 0 : i32
    return %c0_i32, %c0_i32_0 : i32, i32
  }
  func.func @transform_3(%arg0: i32) -> (i32, i32) {
    %c0_i32 = arith.constant 0 : i32
    %c0_i32_0 = arith.constant 0 : i32
    %c0_i32_1 = arith.constant 0 : i32
    return %c0_i32, %c0_i32_0 : i32, i32
  }
  func.func @transform_4(%arg0: i32) -> (i32, i32) {
    %c0_i32 = arith.constant 0 : i32
    %c0_i32_0 = arith.constant 0 : i32
    %c0_i32_1 = arith.constant 0 : i32
    return %c0_i32, %c0_i32_0 : i32, i32
  }
  func.func @transform_5(%arg0: i32) -> (i32, i32) {
    %c0_i32 = arith.constant 0 : i32
    %c0_i32_0 = arith.constant 0 : i32
    %c0_i32_1 = arith.constant 0 : i32
    return %c0_i32, %c0_i32_0 : i32, i32
  }
  func.func @transform_6(%arg0: i32) -> (i32, i32) {
    %c0_i32 = arith.constant 0 : i32
    %c0_i32_0 = arith.constant 0 : i32
    %c0_i32_1 = arith.constant 0 : i32
    return %c0_i32, %c0_i32_0 : i32, i32
  }
  func.func @transform_7(%arg0: i32) -> (i32, i32) {
    %c0_i32 = arith.constant 0 : i32
    %c0_i32_0 = arith.constant 0 : i32
    %c0_i32_1 = arith.constant 0 : i32
    return %c0_i32, %c0_i32_0 : i32, i32
  }
  func.func @transform_8(%arg0: i32) -> (i32, i32) {
    %c0_i32 = arith.constant 0 : i32
    %c0_i32_0 = arith.constant 0 : i32
    %c0_i32_1 = arith.constant 0 : i32
    return %c0_i32, %c0_i32_0 : i32, i32
  }
  func.func @transform_9(%arg0: i32) -> (i32, i32) {
    %c0_i32 = arith.constant 0 : i32
    %c0_i32_0 = arith.constant 0 : i32
    return %arg0, %c0_i32 : i32, i32
  }
  func.func @transform_10(%arg0: i32) -> (i32, i32, i32) {
    %c0_i32 = arith.constant 0 : i32
    %c0_i32_0 = arith.constant 0 : i32
    %c0_i32_1 = arith.constant 0 : i32
    return %arg0, %c0_i32, %c0_i32_0 : i32, i32, i32
  }
}

</mosaic_0001>

<bundles_post_ra>
// kernel: _forward_impl.1
= control target key start
LH: loop header
LB: loop body
LE: loop exit
PB: predicated region body
PF: predicated region fallthrough
CT: control target
= control target key end

     0   :  { %16 = vsyncpa [#allocation3], 0  ;;  %s1603_s0 = inlined_call_operand.vmem [shape: f32[8,256], index: 0, kind: input, shape index: {}]   ;;  %s1604_s1 = inlined_call_operand.vmem [shape: f32[8,256], index: 1, kind: input, shape index: {}]   ;;  %s1605_s2 = inlined_call_operand.hbm [shape: bf16[256,256], index: 2, kind: input, shape index: {}]   ;;  %s1606_s3 = inlined_call_operand.hbm [shape: bf16[256,256], index: 3, kind: input, shape index: {}]   ;;  %s1607_s4 = inlined_call_operand.vmem [shape: f32[1,256], index: 4, kind: input, shape index: {}]   ;;  %s1608_s5 = inlined_call_operand.hbm [shape: bf16[256,256], index: 5, kind: input, shape index: {}]   ;;  %s1609_s6 = inlined_call_operand.vmem [shape: f32[1,256], index: 6, kind: input, shape index: {}]   ;;  %s1610_s7 = inlined_call_operand.hbm [shape: bf16[256,128], index: 7, kind: input, shape index: {}]   ;;  %s1611_s8 = inlined_call_operand.vmem [shape: f32[1,128], index: 8, kind: input, shape index: {}]   ;;  %s1612_s9 = inlined_call_operand.vmem [shape: f32[8,256], index: 9, kind: output, shape index: {0}]   ;;  %s1613_s10 = inlined_call_operand.vmem [shape: f32[1,8,128], index: 10, kind: output, shape index: {1}]  }
   0x1   :  { %17 = vsyncpa [#allocation5], 0 }
   0x2   :  { %18 = vsyncpa [#allocation8], 0  ;;  %s1439_s13 = smov [#allocation4]   ;;  %s1440_s15 = smov [#allocation2]  }
   0x3   :  { %s40_s14 = sshll.u32 %s1439_s13, 4  ;;  %s28_s16 = sshll.u32 %s1440_s15, 4  ;;  %s41_s14 = int_to_ptr.vmem [resolvable:$true] %s40_s14  ;;  %s1502_s16 = int_to_ptr.vmem [resolvable:$true] %s28_s16 }
   0x4   :  { %s1345_s19 = scalar_lea.hbm %s1606_s3, 4096 }
   0x5   :  { %p1346_p0 = scmp.ne.s32.totalorder %s1606_s3, %s1345_s19  ;;  %p1349_p1 = scmp.lt.u32.totalorder %s1345_s19, %s1606_s3 }
   0x7   :  { %p1351_p2 = pnand %p1349_p1, %p1346_p0 }
   0x9   :  { %1354 = shalt.err (!%p1351_p2)
}
   0xa   :  { %s1355_s24 = scalar_lea.vmem %s41_s14, 4096  ;;  %p1360_p4 = scmp.lt.s32.totalorder %s41_s14, %s41_s14 }
   0xb   :  { %p1356_p3 = scmp.ne.s32.totalorder %s41_s14, %s1355_s24  ;;  %p1361_p5 = scmp.lt.s32.totalorder %s1355_s24, %s1355_s24 }
   0xd   :  { %p1362_p6 = por %p1361_p5, %p1360_p4 }
   0xf   :  { %p1363_p7 = pnand %p1362_p6, %p1356_p3 }
  0x11   :  { %1366 = shalt.err (!%p1363_p7)
}
  0x12   :  { %s1441_s25 = smov 128   ;;  %s1442_s26 = smov 8  }
  0x13   :  { %46 = dma.hbm_to_vmem [thread:$0]  %s1606_s3, 4096, %s41_s14, [#allocation5], %s1441_s25, %s1441_s25, %s1442_s26  }
  0x14   :  { %s1367_s11 = scalar_lea.hbm %s1605_s2, 4096 }
  0x15   :  { %p1368_p8 = scmp.ne.s32.totalorder %s1605_s2, %s1367_s11  ;;  %p1371_p9 = scmp.lt.u32.totalorder %s1367_s11, %s1605_s2 }
  0x17   :  { %p1373_p10 = pnand %p1371_p9, %p1368_p8 }
  0x19   :  { %1376 = shalt.err (!%p1373_p10)
}
  0x1a   :  { %s1377_s18 = scalar_lea.vmem %s1502_s16, 4096  ;;  %p1382_p12 = scmp.lt.s32.totalorder %s1502_s16, %s1502_s16 }
  0x1b   :  { %p1378_p11 = scmp.ne.s32.totalorder %s1502_s16, %s1377_s18  ;;  %p1383_p13 = scmp.lt.s32.totalorder %s1377_s18, %s1377_s18 }
  0x1d   :  { %p1384_p0 = por %p1383_p13, %p1382_p12 }
  0x1f   :  { %p1385_p1 = pnand %p1384_p0, %p1378_p11 }
  0x21   :  { %1388 = shalt.err (!%p1385_p1)
}
  0x22   :  { %34 = dma.hbm_to_vmem [thread:$0]  %s1605_s2, 4096, %s1502_s16, [#allocation3], %s1441_s25, %s1441_s25, %s1442_s26  }
  0x23   :  { %s1443_s19 = smov [#allocation6]   ;;  %s1444_s21 = smov [#allocation7]  }
  0x24   :  { %s54_s20 = sshll.u32 %s1443_s19, 4  ;;  %s68_s22 = sshll.u32 %s1444_s21, 4  ;;  %s55_s20 = int_to_ptr.vmem [resolvable:$true] %s54_s20  ;;  %s1539_s22 = int_to_ptr.vmem [resolvable:$true] %s68_s22 }
  0x25   :  { %s1389_s27 = scalar_lea.hbm %s1608_s5, 4096 }
  0x26   :  { %p1390_p2 = scmp.ne.s32.totalorder %s1608_s5, %s1389_s27  ;;  %p1393_p3 = scmp.lt.u32.totalorder %s1389_s27, %s1608_s5 }
  0x28   :  { %p1395_p4 = pnand %p1393_p3, %p1390_p2 }
  0x2a   :  { %1398 = shalt.err (!%p1395_p4)
}
  0x2b   :  { %s1399_s2 = scalar_lea.vmem %s55_s20, 4096  ;;  %p1404_p6 = scmp.lt.s32.totalorder %s55_s20, %s55_s20 }
  0x2c   :  { %p1400_p5 = scmp.ne.s32.totalorder %s55_s20, %s1399_s2  ;;  %p1405_p7 = scmp.lt.s32.totalorder %s1399_s2, %s1399_s2 }
  0x2e   :  { %p1406_p8 = por %p1405_p7, %p1404_p6 }
  0x30   :  { %p1407_p9 = pnand %p1406_p8, %p1400_p5 }
  0x32   :  { %1410 = shalt.err (!%p1407_p9)
}
  0x33   :  { %60 = dma.hbm_to_vmem [thread:$0]  %s1608_s5, 4096, %s55_s20, [#allocation5], %s1441_s25, %s1441_s25, %s1442_s26  }
  0x34   :  { %s1411_s17 = scalar_lea.hbm %s1610_s7, 2048 }
  0x35   :  { %p1412_p10 = scmp.ne.s32.totalorder %s1610_s7, %s1411_s17  ;;  %p1415_p11 = scmp.lt.u32.totalorder %s1411_s17, %s1610_s7 }
  0x37   :  { %p1417_p12 = pnand %p1415_p11, %p1412_p10 }
  0x39   :  { %1420 = shalt.err (!%p1417_p12)
}
  0x3a   :  { %s1421_s21 = scalar_lea.vmem %s1539_s22, 2048  ;;  %p1426_p0 = scmp.lt.s32.totalorder %s1539_s22, %s1539_s22 }
  0x3b   :  { %p1422_p13 = scmp.ne.s32.totalorder %s1539_s22, %s1421_s21  ;;  %p1427_p1 = scmp.lt.s32.totalorder %s1421_s21, %s1421_s21 }
  0x3d   :  { %p1428_p2 = por %p1427_p1, %p1426_p0 }
  0x3f   :  { %p1429_p3 = pnand %p1428_p2, %p1422_p13 }
  0x41   :  { %1432 = shalt.err (!%p1429_p3)
}
  0x42   :  { %s1445_s5 = smov 64   ;;  %s1446_s25 = smov 4  }
  0x43   :  { %74 = dma.hbm_to_vmem [thread:$0]  %s1610_s7, 2048, %s1539_s22, [#allocation8], %s1445_s5, %s1445_s5, %s1446_s25  }
  0x44   :  { %1433 = dma.done.wait [#allocation3], 4096  }
  0x45   :  { %1434 = vsyncadd [#allocation3], 4294963200 }
  0x46   :  { %1435 = dma.done.wait [#allocation5], 8192  }
  0x47   :  { %1436 = vsyncadd [#allocation5], 4294959104 }
  0x48   :  { %1437 = dma.done.wait [#allocation8], 2048  }
  0x49   :  { %1438 = vsyncadd [#allocation8], 4294965248  ;;  %v1181_v0 = vld [vmem:[#allocation4 + $0x4] ss:$8 sps:$4 sm:$0xff]   ;;  %v1185_v2 = vld [vmem:[#allocation4] ss:$8 sps:$4 sm:$0xff]  }
  0x4a   :  { %v1183_v1 = vld [vmem:[#allocation2 + $0x4] ss:$8 sps:$4 sm:$0xff]   ;;  %322 = vmatprep.subr.bf16.mxu0 %v1181_v0  ;;  %v1186_v3 = vld [vmem:[#allocation2] ss:$8 sps:$4 sm:$0xff]   ;;  %v1187_v4 = vld [vmem:[#allocation4 + $0x14] ss:$8 sps:$4 sm:$0xff]  }
  0x4b   :  { %523 = vmatprep.subr.bf16.mxu1 %v1183_v1  ;;  %323 = vmatpush1.bf16.msra.mxu0 %v1185_v2  ;;  %v1189_v5 = vld [vmem:[#allocation2 + $0x14] ss:$8 sps:$4 sm:$0xff]   ;;  %v1191_v6 = vld [vmem:[#allocation4 + $0x10] ss:$8 sps:$4 sm:$0xff]   ;;  %v1193_v8 = vld [vmem:[#allocation4 + $0x24] ss:$8 sps:$4 sm:$0xff]  }
  0x4c   :  { %524 = vmatpush1.bf16.msra.mxu1 %v1186_v3  ;;  %324 = vmatprep.subr.bf16.mxu0 %v1187_v4  ;;  %v1192_v7 = vld [vmem:[#allocation2 + $0x10] ss:$8 sps:$4 sm:$0xff]   ;;  %v1195_v9 = vld [vmem:[#allocation2 + $0x24] ss:$8 sps:$4 sm:$0xff]   ;;  %v1197_v10 = vld [vmem:[#allocation4 + $0x20] ss:$8 sps:$4 sm:$0xff]  }
  0x4d   :  { %525 = vmatprep.subr.bf16.mxu1 %v1189_v5  ;;  %v1198_v11 = vld [vmem:[#allocation2 + $0x20] ss:$8 sps:$4 sm:$0xff]   ;;  %v1199_v12 = vld [vmem:[#allocation4 + $0x34] ss:$8 sps:$4 sm:$0xff]   ;;  %v1203_v14 = vld [vmem:[#allocation4 + $0x30] ss:$8 sps:$4 sm:$0xff]  }
  0x4e   :  { %v1201_v13 = vld [vmem:[#allocation2 + $0x34] ss:$8 sps:$4 sm:$0xff]   ;;  %v1204_v15 = vld [vmem:[#allocation2 + $0x30] ss:$8 sps:$4 sm:$0xff]   ;;  %v1205_v16 = vld [vmem:[#allocation4 + $0x44] ss:$8 sps:$4 sm:$0xff]  }
  0x4f   :  { %325 = vmatpush1.bf16.msra.mxu0 %v1191_v6  ;;  %v1207_v17 = vld [vmem:[#allocation2 + $0x44] ss:$8 sps:$4 sm:$0xff]   ;;  %v1209_v18 = vld [vmem:[#allocation4 + $0x40] ss:$8 sps:$4 sm:$0xff]   ;;  %v1211_v20 = vld [vmem:[#allocation4 + $0x54] ss:$8 sps:$4 sm:$0xff]  }
  0x50   :  { %526 = vmatpush1.bf16.msra.mxu1 %v1192_v7  ;;  %326 = vmatprep.subr.bf16.mxu0 %v1193_v8  ;;  %v1210_v19 = vld [vmem:[#allocation2 + $0x40] ss:$8 sps:$4 sm:$0xff]   ;;  %v1213_v21 = vld [vmem:[#allocation2 + $0x54] ss:$8 sps:$4 sm:$0xff]   ;;  %v1215_v22 = vld [vmem:[#allocation4 + $0x50] ss:$8 sps:$4 sm:$0xff]  }
  0x51   :  { %527 = vmatprep.subr.bf16.mxu1 %v1195_v9  ;;  %v1216_v23 = vld [vmem:[#allocation2 + $0x50] ss:$8 sps:$4 sm:$0xff]   ;;  %v1217_v24 = vld [vmem:[#allocation4 + $0x64] ss:$8 sps:$4 sm:$0xff]   ;;  %v1221_v26 = vld [vmem:[#allocation4 + $0x60] ss:$8 sps:$4 sm:$0xff]  }
  0x52   :  { %v1219_v25 = vld [vmem:[#allocation2 + $0x64] ss:$8 sps:$4 sm:$0xff]   ;;  %v1222_v27 = vld [vmem:[#allocation2 + $0x60] ss:$8 sps:$4 sm:$0xff]   ;;  %v1223_v28 = vld [vmem:[#allocation4 + $0x74] ss:$8 sps:$4 sm:$0xff]  }
  0x53   :  { %327 = vmatpush1.bf16.msra.mxu0 %v1197_v10  ;;  %v1225_v29 = vld [vmem:[#allocation2 + $0x74] ss:$8 sps:$4 sm:$0xff]   ;;  %v1227_v30 = vld [vmem:[#allocation4 + $0x70] ss:$8 sps:$4 sm:$0xff]   ;;  %v1229_v32 = vld [vmem:[#allocation4 + $0x84] ss:$8 sps:$4 sm:$0xff]  }
  0x54   :  { %528 = vmatpush1.bf16.msra.mxu1 %v1198_v11  ;;  %328 = vmatprep.subr.bf16.mxu0 %v1199_v12  ;;  %v1228_v31 = vld [vmem:[#allocation2 + $0x70] ss:$8 sps:$4 sm:$0xff]   ;;  %v1231_v33 = vld [vmem:[#allocation2 + $0x84] ss:$8 sps:$4 sm:$0xff]   ;;  %v1233_v34 = vld [vmem:[#allocation4 + $0x80] ss:$8 sps:$4 sm:$0xff]  }
  0x55   :  { %529 = vmatprep.subr.bf16.mxu1 %v1201_v13  ;;  %v1234_v35 = vld [vmem:[#allocation2 + $0x80] ss:$8 sps:$4 sm:$0xff]   ;;  %v1235_v36 = vld [vmem:[#allocation4 + $0x94] ss:$8 sps:$4 sm:$0xff]   ;;  %v1239_v38 = vld [vmem:[#allocation4 + $0x90] ss:$8 sps:$4 sm:$0xff]  }
  0x56   :  { %v1237_v37 = vld [vmem:[#allocation2 + $0x94] ss:$8 sps:$4 sm:$0xff]   ;;  %v1240_v39 = vld [vmem:[#allocation2 + $0x90] ss:$8 sps:$4 sm:$0xff]   ;;  %v1241_v40 = vld [vmem:[#allocation4 + $0xa4] ss:$8 sps:$4 sm:$0xff]  }
  0x57   :  { %329 = vmatpush1.bf16.msra.mxu0 %v1203_v14  ;;  %v1243_v41 = vld [vmem:[#allocation2 + $0xa4] ss:$8 sps:$4 sm:$0xff]   ;;  %v1245_v42 = vld [vmem:[#allocation4 + $0xa0] ss:$8 sps:$4 sm:$0xff]   ;;  %v1247_v44 = vld [vmem:[#allocation4 + $0xb4] ss:$8 sps:$4 sm:$0xff]  }
  0x58   :  { %530 = vmatpush1.bf16.msra.mxu1 %v1204_v15  ;;  %330 = vmatprep.subr.bf16.mxu0 %v1205_v16  ;;  %v1246_v43 = vld [vmem:[#allocation2 + $0xa0] ss:$8 sps:$4 sm:$0xff]   ;;  %v1249_v45 = vld [vmem:[#allocation2 + $0xb4] ss:$8 sps:$4 sm:$0xff]   ;;  %v1251_v47 = vld [vmem:[#allocation4 + $0xb0] ss:$8 sps:$4 sm:$0xff]  }
  0x59   :  { %531 = vmatprep.subr.bf16.mxu1 %v1207_v17  ;;  %v95_v46 = vld [vmem:[%s1604_s1 + $0x8] sm:$0xff]  ;;  %v1252_v48 = vld [vmem:[#allocation2 + $0xb0] ss:$8 sps:$4 sm:$0xff]   ;;  %v1259_v56 = vld [vmem:[#allocation4 + $0xd4] ss:$8 sps:$4 sm:$0xff]  }
  0x5a   :  { %v97_v49 = vpack.c.bf16 %v95_v46, %v95_v46  ;;  %v91_v50 = vld [vmem:[%s1603_s0 + $0x8] sm:$0xff]  ;;  %v1261_v57 = vld [vmem:[#allocation2 + $0xd4] ss:$8 sps:$4 sm:$0xff]   ;;  %v1263_v58 = vld [vmem:[#allocation4 + $0xd0] ss:$8 sps:$4 sm:$0xff]  }
  0x5b   :  { %331 = vmatpush1.bf16.msra.mxu0 %v1209_v18  ;;  %v1253_v51 = vld [vmem:[#allocation4 + $0xc4] ss:$8 sps:$4 sm:$0xff]   ;;  %v93_v52 = vpack.c.bf16 %v91_v50, %v91_v50  ;;  %v1257_v54 = vld [vmem:[#allocation4 + $0xc0] ss:$8 sps:$4 sm:$0xff]   ;;  %v1264_v59 = vld [vmem:[#allocation2 + $0xd0] ss:$8 sps:$4 sm:$0xff]  }
  0x5c   :  { %532 = vmatpush1.bf16.msra.mxu1 %v1210_v19  ;;  %332 = vmatprep.subr.bf16.mxu0 %v1211_v20  ;;  %v1255_v53 = vld [vmem:[#allocation2 + $0xc4] ss:$8 sps:$4 sm:$0xff]   ;;  %v1258_v55 = vld [vmem:[#allocation2 + $0xc0] ss:$8 sps:$4 sm:$0xff]   ;;  %v1271_v0 = vld [vmem:[#allocation4 + $0xf4] ss:$8 sps:$4 sm:$0xff]  }
  0x5d   :  { %533 = vmatprep.subr.bf16.mxu1 %v1213_v21  ;;  %354 = vmatprep.mubr.bf16.mxu0 %v97_v49  ;;  %v1265_v60 = vld [vmem:[#allocation4 + $0xe4] ss:$8 sps:$4 sm:$0xff]   ;;  %v1269_v62 = vld [vmem:[#allocation4 + $0xe0] ss:$8 sps:$4 sm:$0xff]   ;;  %v1273_v1 = vld [vmem:[#allocation2 + $0xf4] ss:$8 sps:$4 sm:$0xff]  }
  0x5e   :  { %555 = vmatprep.mubr.bf16.mxu1 %v93_v52  ;;  %v1267_v61 = vld [vmem:[#allocation2 + $0xe4] ss:$8 sps:$4 sm:$0xff]   ;;  %v1270_v63 = vld [vmem:[#allocation2 + $0xe0] ss:$8 sps:$4 sm:$0xff]   ;;  %v1275_v2 = vld [vmem:[#allocation4 + $0xf0] ss:$8 sps:$4 sm:$0xff]  }
  0x5f   :  { %333 = vmatpush1.bf16.msra.mxu0 %v1215_v22  ;;  %v1276_v3 = vld [vmem:[#allocation2 + $0xf0] ss:$8 sps:$4 sm:$0xff]   ;;  %v94_v4 = vld [vmem:[%s1604_s1] sm:$0xff]  ;;  %v1282_v10 = vld [vmem:[#allocation6 + $0x14] ss:$8 sps:$4 sm:$0xff]  }
  0x60   :  { %534 = vmatpush1.bf16.msra.mxu1 %v1216_v23  ;;  %334 = vmatprep.subr.bf16.mxu0 %v1217_v24  ;;  %v90_v5 = vld [vmem:[%s1603_s0] sm:$0xff]  ;;  %v96_v8 = vpack.c.bf16 %v94_v4, %v94_v4  ;;  %v1280_v11 = vld [vmem:[#allocation6 + $0x10] ss:$8 sps:$4 sm:$0xff]   ;;  %v1288_v14 = vld [vmem:[#allocation6 + $0x34] ss:$8 sps:$4 sm:$0xff]  }
  0x61   :  { %535 = vmatprep.subr.bf16.mxu1 %v1219_v25  ;;  %v1279_v6 = vld [vmem:[#allocation6 + $0x4] ss:$8 sps:$4 sm:$0xff]   ;;  %v1277_v7 = vld [vmem:[#allocation6] ss:$8 sps:$4 sm:$0xff]   ;;  %v92_v9 = vpack.c.bf16 %v90_v5, %v90_v5  ;;  %v1286_v15 = vld [vmem:[#allocation6 + $0x30] ss:$8 sps:$4 sm:$0xff]  }
  0x62   :  { %v1285_v12 = vld [vmem:[#allocation6 + $0x24] ss:$8 sps:$4 sm:$0xff]   ;;  %v1283_v13 = vld [vmem:[#allocation6 + $0x20] ss:$8 sps:$4 sm:$0xff]   ;;  %v1294_v18 = vld [vmem:[#allocation6 + $0x54] ss:$8 sps:$4 sm:$0xff]  }
  0x63   :  { %335 = vmatpush1.bf16.msra.mxu0 %v1221_v26  ;;  %v1291_v16 = vld [vmem:[#allocation6 + $0x44] ss:$8 sps:$4 sm:$0xff]   ;;  %v1289_v17 = vld [vmem:[#allocation6 + $0x40] ss:$8 sps:$4 sm:$0xff]   ;;  %v1292_v19 = vld [vmem:[#allocation6 + $0x50] ss:$8 sps:$4 sm:$0xff]  }
  0x64   :  { %536 = vmatpush1.bf16.msra.mxu1 %v1222_v27  ;;  %336 = vmatprep.subr.bf16.mxu0 %v1223_v28  ;;  %v1297_v20 = vld [vmem:[#allocation6 + $0x64] ss:$8 sps:$4 sm:$0xff]   ;;  %v1295_v21 = vld [vmem:[#allocation6 + $0x60] ss:$8 sps:$4 sm:$0xff]   ;;  %v1300_v22 = vld [vmem:[#allocation6 + $0x74] ss:$8 sps:$4 sm:$0xff]  }
  0x65   :  { %537 = vmatprep.subr.bf16.mxu1 %v1225_v29  ;;  %v1298_v23 = vld [vmem:[#allocation6 + $0x70] ss:$8 sps:$4 sm:$0xff]   ;;  %v1303_v24 = vld [vmem:[#allocation6 + $0x84] ss:$8 sps:$4 sm:$0xff]   ;;  %v1301_v25 = vld [vmem:[#allocation6 + $0x80] ss:$8 sps:$4 sm:$0xff]  }
  0x66   :  { %v1306_v26 = vld [vmem:[#allocation6 + $0x94] ss:$8 sps:$4 sm:$0xff]   ;;  %v1304_v27 = vld [vmem:[#allocation6 + $0x90] ss:$8 sps:$4 sm:$0xff]   ;;  %v1309_v28 = vld [vmem:[#allocation6 + $0xa4] ss:$8 sps:$4 sm:$0xff]  }
  0x67   :  { %337 = vmatpush1.bf16.msra.mxu0 %v1227_v30  ;;  %v1307_v29 = vld [vmem:[#allocation6 + $0xa0] ss:$8 sps:$4 sm:$0xff]   ;;  %v1312_v30 = vld [vmem:[#allocation6 + $0xb4] ss:$8 sps:$4 sm:$0xff]  }
  0x68   :  { %538 = vmatpush1.bf16.msra.mxu1 %v1228_v31  ;;  %338 = vmatprep.subr.bf16.mxu0 %v1229_v32  ;;  %v1310_v31 = vld [vmem:[#allocation6 + $0xb0] ss:$8 sps:$4 sm:$0xff]   ;;  %v1315_v32 = vld [vmem:[#allocation6 + $0xc4] ss:$8 sps:$4 sm:$0xff]  }
  0x69   :  { %539 = vmatprep.subr.bf16.mxu1 %v1231_v33  ;;  %v1313_v33 = vld [vmem:[#allocation6 + $0xc0] ss:$8 sps:$4 sm:$0xff]   ;;  %v1331_v46 = vld [vmem:[#allocation7 + $0x58] sm:$0xff]   ;;  %v1337_v52 = vld [vmem:[#allocation7 + $0x70] sm:$0xff]  }
  0x6a   :  { %v1334_v49 = vld [vmem:[#allocation7 + $0x20] sm:$0xff]   ;;  %v1335_v50 = vld [vmem:[#allocation7 + $0x68] sm:$0xff]  }
  0x6b   :  { %339 = vmatpush1.bf16.msra.mxu0 %v1233_v34  ;;  %v1318_v34 = vld [vmem:[#allocation6 + $0xd4] ss:$8 sps:$4 sm:$0xff]  }
  0x6c   :  { %540 = vmatpush1.bf16.msra.mxu1 %v1234_v35  ;;  %340 = vmatprep.subr.bf16.mxu0 %v1235_v36  ;;  %v1316_v35 = vld [vmem:[#allocation6 + $0xd0] ss:$8 sps:$4 sm:$0xff]   ;;  %v1321_v36 = vld [vmem:[#allocation6 + $0xe4] ss:$8 sps:$4 sm:$0xff]  }
  0x6d   :  { %541 = vmatprep.subr.bf16.mxu1 %v1237_v37  ;;  %v1319_v37 = vld [vmem:[#allocation6 + $0xe0] ss:$8 sps:$4 sm:$0xff]  }
  0x6f   :  { %341 = vmatpush1.bf16.msra.mxu0 %v1239_v38  ;;  %v1324_v38 = vld [vmem:[#allocation6 + $0xf4] ss:$8 sps:$4 sm:$0xff]  }
  0x70   :  { %542 = vmatpush1.bf16.msra.mxu1 %v1240_v39  ;;  %342 = vmatprep.subr.bf16.mxu0 %v1241_v40  ;;  %v1322_v39 = vld [vmem:[#allocation6 + $0xf0] ss:$8 sps:$4 sm:$0xff]   ;;  %v1325_v40 = vld [vmem:[#allocation7 + $0x40] sm:$0xff]  }
  0x71   :  { %543 = vmatprep.subr.bf16.mxu1 %v1243_v41  ;;  %v1326_v41 = vld [vmem:[#allocation7] sm:$0xff]  }
  0x73   :  { %343 = vmatpush1.bf16.msra.mxu0 %v1245_v42  ;;  %v1327_v42 = vld [vmem:[#allocation7 + $0x48] sm:$0xff]  }
  0x74   :  { %544 = vmatpush1.bf16.msra.mxu1 %v1246_v43  ;;  %344 = vmatprep.subr.bf16.mxu0 %v1247_v44  ;;  %v1328_v43 = vld [vmem:[#allocation7 + $0x8] sm:$0xff]   ;;  %v1329_v44 = vld [vmem:[#allocation7 + $0x50] sm:$0xff]  }
  0x75   :  { %545 = vmatprep.subr.bf16.mxu1 %v1249_v45  ;;  %v1330_v45 = vld [vmem:[#allocation7 + $0x10] sm:$0xff]  }
  0x77   :  { %345 = vmatpush1.bf16.msra.mxu0 %v1251_v47  ;;  %v1332_v47 = vld [vmem:[#allocation7 + $0x18] sm:$0xff]  }
  0x78   :  { %546 = vmatpush1.bf16.msra.mxu1 %v1252_v48  ;;  %346 = vmatprep.subr.bf16.mxu0 %v1253_v51  ;;  %v1333_v48 = vld [vmem:[#allocation7 + $0x60] sm:$0xff]   ;;  %v1336_v51 = vld [vmem:[#allocation7 + $0x28] sm:$0xff]  }
  0x79   :  { %547 = vmatprep.subr.bf16.mxu1 %v1255_v53  ;;  %v566_v53 = vlaneseq }
  0x7b   :  { %347 = vmatpush1.bf16.msra.mxu0 %v1257_v54  ;;  %v567_v54 = vshrl.u32 %v566_v53, 7 }
  0x7c   :  { %548 = vmatpush1.bf16.msra.mxu1 %v1258_v55  ;;  %348 = vmatprep.subr.bf16.mxu0 %v1259_v56  ;;  %v564_v56 = vld [vmem:[%s1607_s4] sm:$0x3] }
  0x7d   :  { %549 = vmatprep.subr.bf16.mxu1 %v1261_v57  ;;  %v568_v55 = vsub.s32 0, %v567_v54  ;;  %v572_v57 = vsub.s32 1, %v567_v54  ;;  %vm1017_vm0 = vcmp.lt.s32.totalorder %v567_v54, 2 }
  0x7f   :  { %349 = vmatpush1.bf16.msra.mxu0 %v1263_v58  ;;  %v569_v58 = vrot.slane %v564_v56, %v568_v55 }
  0x80   :  { %550 = vmatpush1.bf16.msra.mxu1 %v1264_v59  ;;  %350 = vmatprep.subr.bf16.mxu0 %v1265_v60 }
  0x81   :  { %551 = vmatprep.subr.bf16.mxu1 %v1267_v61  ;;  %v573_v61 = vrot.slane %v564_v56, %v572_v57 }
  0x83   :  { %351 = vmatpush1.bf16.msra.mxu0 %v1269_v62 }
  0x84   :  { %552 = vmatpush1.bf16.msra.mxu1 %v1270_v63  ;;  %352 = vmatprep.subr.bf16.mxu0 %v1271_v0 }
  0x85   :  { %553 = vmatprep.subr.bf16.mxu1 %v1273_v1 }
  0x87   :  { %353 = vmatpush1.bf16.msra.mxu0 %v1275_v2 }
  0x88   :  { %554 = vmatpush1.bf16.msra.mxu1 %v1276_v3  ;;  %786 = vmatprep.subr.bf16.mxu0 %v1279_v6 }
  0x89   :  { %1151 = vmatprep.subr.bf16.mxu1 %v1325_v40 }
  0x8a   :  { %355 = vmatmul.mubr.bf16.vlgmr.msra.gmra.mrb[0].mxu0 %v96_v8 }
  0x8b   :  { %556 = vmatmul.mubr.bf16.vlgmr.msra.gmra.mrb[0].mxu1 %v92_v9  ;;  %787 = vmatpush1.bf16.msra.mxu0 %v1277_v7 }
  0x8c   :  { %788 = vmatprep.subr.bf16.mxu0 %v1282_v10  ;;  %1152 = vmatpush3.bf16.msra.mxu1 %v1326_v41 }
  0x8d   :  { %1153 = vmatprep.subr.bf16.mxu1 %v1327_v42 }
  0x8f   :  { %789 = vmatpush1.bf16.msra.mxu0 %v1280_v11 }
  0x90   :  { %790 = vmatprep.subr.bf16.mxu0 %v1285_v12  ;;  %1154 = vmatpush3.bf16.msra.mxu1 %v1328_v43  ;;  %v1338_v12 = vld [vmem:[#allocation7 + $0x30] sm:$0xff]  }
  0x91   :  { %1155 = vmatprep.subr.bf16.mxu1 %v1329_v44 }
  0x93   :  { %791 = vmatpush1.bf16.msra.mxu0 %v1283_v13  ;;  %v1339_v13 = vld [vmem:[#allocation7 + $0x78] sm:$0xff]  }
  0x94   :  { %792 = vmatprep.subr.bf16.mxu0 %v1288_v14  ;;  %1156 = vmatpush3.bf16.msra.mxu1 %v1330_v45  ;;  %v1340_v14 = vld [vmem:[#allocation7 + $0x38] sm:$0xff]  }
  0x95   :  { %1157 = vmatprep.subr.bf16.mxu1 %v1331_v46 }
  0x97   :  { %793 = vmatpush1.bf16.msra.mxu0 %v1286_v15  ;;  %v614_v15 = vld [vmem:[%s1609_s6] sm:$0x3] }
  0x98   :  { %794 = vmatprep.subr.bf16.mxu0 %v1291_v16  ;;  %1158 = vmatpush3.bf16.msra.mxu1 %v1332_v47  ;;  %v619_v16 = vrot.slane %v614_v15, %v568_v55 }
  0x99   :  { %1159 = vmatprep.subr.bf16.mxu1 %v1333_v48 }
  0x9b   :  { %795 = vmatpush1.bf16.msra.mxu0 %v1289_v17  ;;  %v623_v17 = vrot.slane %v614_v15, %v572_v57 }
  0x9c   :  { %796 = vmatprep.subr.bf16.mxu0 %v1294_v18  ;;  %1160 = vmatpush3.bf16.msra.mxu1 %v1334_v49 }
  0x9d   :  { %1161 = vmatprep.subr.bf16.mxu1 %v1335_v50 }
  0x9f   :  { %797 = vmatpush1.bf16.msra.mxu0 %v1292_v19 }
  0xa0   :  { %798 = vmatprep.subr.bf16.mxu0 %v1297_v20  ;;  %1162 = vmatpush3.bf16.msra.mxu1 %v1336_v51 }
  0xa1   :  { %1163 = vmatprep.subr.bf16.mxu1 %v1337_v52 }
  0xa3   :  { %799 = vmatpush1.bf16.msra.mxu0 %v1295_v21 }
  0xa4   :  { %800 = vmatprep.subr.bf16.mxu0 %v1300_v22  ;;  %1164 = vmatpush3.bf16.msra.mxu1 %v1338_v12 }
  0xa5   :  { %1165 = vmatprep.subr.bf16.mxu1 %v1339_v13 }
  0xa7   :  { %801 = vmatpush1.bf16.msra.mxu0 %v1298_v23 }
  0xa8   :  { %802 = vmatprep.subr.bf16.mxu0 %v1303_v24  ;;  %1166 = vmatpush3.bf16.msra.mxu1 %v1340_v14 }
  0xab   :  { %803 = vmatpush1.bf16.msra.mxu0 %v1301_v25 }
  0xac   :  { %804 = vmatprep.subr.bf16.mxu0 %v1306_v26 }
  0xaf   :  { %805 = vmatpush1.bf16.msra.mxu0 %v1304_v27  ;;  %v1133_v27 = vld [vmem:[%s1611_s8] ss:$0 sm:$0xff] }
  0xb0   :  { %806 = vmatprep.subr.bf16.mxu0 %v1309_v28 }
  0xb3   :  { %807 = vmatpush1.bf16.msra.mxu0 %v1307_v29 }
  0xb4   :  { %808 = vmatprep.subr.bf16.mxu0 %v1312_v30 }
  0xb7   :  { %809 = vmatpush1.bf16.msra.mxu0 %v1310_v31 }
  0xb8   :  { %810 = vmatprep.subr.bf16.mxu0 %v1315_v32 }
  0xbb   :  { %811 = vmatpush1.bf16.msra.mxu0 %v1313_v33 }
  0xbc   :  { %812 = vmatprep.subr.bf16.mxu0 %v1318_v34 }
  0xbf   :  { %813 = vmatpush1.bf16.msra.mxu0 %v1316_v35 }
  0xc0   :  { %814 = vmatprep.subr.bf16.mxu0 %v1321_v36 }
  0xc3   :  { %815 = vmatpush1.bf16.msra.mxu0 %v1319_v37 }
  0xc4   :  { %816 = vmatprep.subr.bf16.mxu0 %v1324_v38 }
  0xc7   :  { %817 = vmatpush1.bf16.msra.mxu0 %v1322_v39 }
 0x15d   :  { %v356_v59 = vpop.f32.mrb[0].mxu0 }
 0x15e   :  { %v557_v60 = vpop.f32.mrb[0].mxu1  ;;  %v358_v63 = vpop.f32.mrb[1].mxu0 }
 0x15f   :  { %v558_v62 = vadd.f32 %v557_v60, %v356_v59  ;;  %v559_v0 = vpop.f32.mrb[1].mxu1  ;;  %v360_v2 = vpop.f32.mrb[2].mxu0 }
 0x160   :  { %v560_v1 = vadd.f32 %v559_v0, %v358_v63  ;;  %v561_v3 = vpop.f32.mrb[2].mxu1  ;;  %v361_v5 = vpop.f32.mrb[3].mxu0 }
 0x161   :  { %v576_v4 = vadd.f32 %v569_v58, %v558_v62  ;;  %v562_v6 = vpop.f32.mrb[3].mxu1 }
 0x162   :  { %v577_v7 = vadd.f32 %v573_v61, %v560_v1 }
 0x163   :  { %v578_v8 = vmax.f32 %v576_v4, 0.0 }
 0x164   :  { %v579_v9 = vmax.f32 %v577_v7, 0.0 }
 0x165   :  { %v580_v11 = vpack.c.bf16 %v578_v8, %v578_v8 }
 0x166   :  { %v581_v10 = vpack.c.bf16 %v579_v9, %v579_v9 }
 0x168   :  { %818 = vmatprep.mubr.bf16.mxu0 %v581_v10 }
 0x169   :  { %819 = vmatmul.mubr.bf16.vlgmr.msra.gmra.mrb[4].mxu0 %v580_v11 }
 0x23c   :  { %v820_v18 = vpop.f32.mrb[4].mxu0 }
 0x23d   :  { %v821_v19 = vadd.f32 %v820_v18, %v619_v16  ;;  %v822_v20 = vpop.f32.mrb[5].mxu0 }
 0x23e   :  { %v823_v21 = vadd.f32 %v822_v20, %v623_v17  ;;  %v824_v22 = vpop.f32.mrb[6].mxu0 }
 0x23f   :  { %827 = vst [vmem:[%s1612_s9] sm:$0xff] %v821_v19  ;;  %v825_v23 = vpop.f32.mrb[7].mxu0  ;;  %v829_v25 = vpack.c.bf16 %v821_v19, %v821_v19 }
 0x240   :  { %828 = vst [vmem:[%s1612_s9 + $0x8] sm:$0xff] %v823_v21  ;;  %v830_v24 = vpack.c.bf16 %v823_v21, %v823_v21 }
 0x242   :  { %998 = vmatprep.mubr.bf16.mxu1 %v830_v24 }
 0x243   :  { %999 = vmatmul.mubr.bf16.vlgmr.msra.gmra.mrb[4].mxu1 %v829_v25 }
 0x316   :  { %v1167_v26 = vpop.f32.mrb[4].mxu1 }
 0x317   :  { %v1168_v28 = vpop.f32.mrb[5].mxu1 }
 0x318   :  { %v1169_v29 = vadd.f32 %v1168_v28, %v1167_v26  ;;  %v1170_v30 = vpop.f32.mrb[6].mxu1 }
 0x319   :  { %v1171_v31 = vpop.f32.mrb[7].mxu1 }
 0x31a   :  { %v1001_v32 = vadd.f32 %v1169_v29, %v1133_v27 }
 0x31c   :  { %v1150_v33 = vmul.f32 -1.442695, %v1001_v32 }
 0x31e   :  { %1341 = vpow2.f32 %v1150_v33 }
 0x328   :  { %v1342_v34 = vpop.eup %1341 }
 0x329   :  { %v1009_v35 = vadd.f32 1.0, %v1342_v34 }
 0x32b   :  { %1343 = vrcp.f32 %v1009_v35 }
 0x335   :  { %v1344_v36 = vpop.eup %1343 }
 0x336   :  { %v1018_v37 = vsel %vm1017_vm0, %v1344_v36, 0.0 }
 0x337   :  { %v1019_v38 = vrot.slane %v1018_v37, 4 }
 0x339   :  { %v1020_v39 = vadd.f32 %v1019_v38, %v1018_v37 }
 0x33b   :  { %v1021_v40 = vrot.slane %v1020_v39, 2 }
 0x33d   :  { %v1022_v41 = vadd.f32 %v1021_v40, %v1020_v39 }
 0x33f   :  { %v1023_v42 = vrot.slane %v1022_v41, 1 }
 0x341   :  { %v1024_v43 = vadd.f32 %v1023_v42, %v1022_v41 }
 0x343   :  { %1025 = vst [vmem:[%s1613_s10] sm:$0xff] %v1024_v43 }
 0x344   :  { %1034 = vsyncpa [#allocation3], 1 }
 0x345   :  { %1035 = vsyncpa [#allocation5], 1 }
 0x346   :  { %1036 = vsyncpa [#allocation8], 1 }

</bundles_post_ra>
